<compile_context>
chip_gen: v5e
topology: v5e:2x2
jax: 0.10.0
libtpu: 0.0.40
codegen_flags: <defaults>
</compile_context>

<pallas_src>
import jax
import jax.numpy as jnp
from jax.experimental import pallas as pl
from jax.experimental.pallas import tpu as pltpu


def _frozen_bn_kernel(scale_ref, shift_ref, x_ref, o_ref):
    # x_ref/o_ref: (TR, TS); scale_ref/shift_ref: (TR, 1) -> broadcast over lanes.
    x = x_ref[...].astype(jnp.float32)
    o_ref[...] = (x * scale_ref[...] + shift_ref[...]).astype(o_ref.dtype)


def _round_up(a, b):
    return (a + b - 1) // b * b


def _choose_tiles(R, S, itemsize, target_bytes):
    """Pick (TR, TS) block dims.

    TR is a multiple of the packed-dtype sublane count, TS is either the full
    spatial extent or a multiple of 128.  Ragged tails are handled by the
    cdiv grid + Pallas masking, so blocks never silently balloon past the
    VMEM budget.
    """
    sub = max(8, 32 // itemsize)           # 8 (f32), 16 (bf16), 32 (int8/fp8)
    lane = 128
    s_pad = _round_up(S, lane)

    # Minimum block is `sub` full-S rows; if that already blows the budget,
    # split the spatial axis on 128-lane boundaries instead.
    if sub * s_pad * itemsize <= target_bytes:
        ts = S                              # full extent -> OK even if S%128!=0
        row_bytes = s_pad * itemsize
    else:
        ts = max(lane, (target_bytes // (sub * itemsize)) // lane * lane)
        row_bytes = ts * itemsize

    tr = max(sub, (target_bytes // row_bytes) // sub * sub)
    tr = min(tr, _round_up(R, sub))
    return tr, ts


def frozen_batch_norm_2d(x, weight, bias, running_mean, running_var,
                         *, eps=1e-05, target_block_bytes=8 << 20):
    """x: (N, C, H, W); weight/bias/running_mean/running_var: (C,)."""
    N, C, H, W = x.shape
    S = H * W
    R = N * C

    # Fold frozen statistics into per-channel scale/shift (f32 math, O(C)).
    scale = (weight.astype(jnp.float32)
             * jax.lax.rsqrt(running_var.astype(jnp.float32) + eps))
    shift = bias.astype(jnp.float32) - running_mean.astype(jnp.float32) * scale
    # Row r of the flattened (N*C, S) view has channel r % C; tile accordingly.
    scale_rows = jnp.tile(scale, N).reshape(R, 1)
    shift_rows = jnp.tile(shift, N).reshape(R, 1)

    x2 = x.reshape(R, S)                    # lane-dense spatial axis
    tr, ts = _choose_tiles(R, S, x.dtype.itemsize, target_block_bytes)
    grid = (pl.cdiv(R, tr), pl.cdiv(S, ts))

    # Scoped-VMEM budget: double-buffered x in + out, plus (tiny) scale/shift,
    # plus headroom; clamped so it fits every generation's physical VMEM.
    x_block_bytes = tr * _round_up(ts, 128) * x.dtype.itemsize
    p_block_bytes = tr * 128 * 4            # lane-padded (TR,1) f32 param block
    vmem_needed = 2 * 2 * x_block_bytes + 2 * 2 * p_block_bytes + (4 << 20)
    vmem_limit = int(min(48 << 20, max(vmem_needed, 16 << 20)))

    grid_spec = pl.GridSpec(
        grid=grid,
        in_specs=[
            pl.BlockSpec((tr, 1), lambda rb, sb: (rb, 0)),      # scale
            pl.BlockSpec((tr, 1), lambda rb, sb: (rb, 0)),      # shift
            pl.BlockSpec((tr, ts), lambda rb, sb: (rb, sb)),    # x
        ],
        out_specs=pl.BlockSpec((tr, ts), lambda rb, sb: (rb, sb)),
    )

    out2 = pl.pallas_call(
        _frozen_bn_kernel,
        out_shape=jax.ShapeDtypeStruct((R, S), x.dtype),
        grid_spec=grid_spec,
        compiler_params=pltpu.CompilerParams(
            dimension_semantics=("parallel", "parallel"),
            vmem_limit_bytes=vmem_limit,
        ),
    )(scale_rows, shift_rows, x2)

    return out2.reshape(N, C, H, W)


if __name__ == "__main__":
    key = jax.random.PRNGKey(0)
    N, C, H, W = 2, 4, 16, 16

    kx, kw, kb, km, kv = jax.random.split(key, 5)
    x = jax.random.normal(kx, (N, C, H, W), dtype=jnp.float32)

    # Deterministic "frozen" buffers (module __init__ values, perturbed so the
    # affine transform is non-trivial).
    weight = jnp.ones((C,), jnp.float32) + 0.1 * jax.random.normal(kw, (C,))
    bias = jnp.zeros((C,), jnp.float32) + 0.1 * jax.random.normal(kb, (C,))
    running_mean = 0.1 * jax.random.normal(km, (C,))
    running_var = jnp.ones((C,), jnp.float32) + 0.1 * jnp.abs(
        jax.random.normal(kv, (C,))
    )

    out = frozen_batch_norm_2d(x, weight, bias, running_mean, running_var)
    out = jax.block_until_ready(out)

    # Reference (pure JAX) check of the frozen-BN math.
    eps = 1e-05
    scale = weight * jax.lax.rsqrt(running_var + eps)
    shift = bias - running_mean * scale
    ref = x * scale[None, :, None, None] + shift[None, :, None, None]
    assert jnp.allclose(out, ref, atol=1e-6, rtol=1e-6), "mismatch vs reference"

    print("KERNEL_OK")
</pallas_src>

<mosaic_0001>
module attributes {stable_mosaic.version = 11 : i64} {
  func.func @_frozen_bn_kernel(%arg0: i32, %arg1: i32, %arg2: memref<8x1xf32, #tpu.memory_space<vmem>>, %arg3: memref<8x1xf32, #tpu.memory_space<vmem>>, %arg4: memref<8x256xf32, #tpu.memory_space<vmem>>, %arg5: memref<8x256xf32, #tpu.memory_space<vmem>>) attributes {dimension_semantics = [#tpu.dimension_semantics<parallel>, #tpu.dimension_semantics<parallel>], iteration_bounds = array<i64: 1, 1>, scalar_prefetch = 0 : i64, scratch_operands = 0 : i64, tpu.core_type = #tpu.core_type<tc>, window_params = [{transform_indices = @transform_0, window_bounds = array<i64: 8, 1>}, {transform_indices = @transform_1, window_bounds = array<i64: 8, 1>}, {transform_indices = @transform_2, window_bounds = array<i64: 8, 256>}, {transform_indices = @transform_3, window_bounds = array<i64: 8, 256>}]} {
    %c0 = arith.constant 0 : index
    %c0_0 = arith.constant 0 : index
    %0 = vector.load %arg4[%c0, %c0_0] : memref<8x256xf32, #tpu.memory_space<vmem>>, vector<8x256xf32>
    %c0_1 = arith.constant 0 : index
    %c0_2 = arith.constant 0 : index
    %1 = vector.load %arg2[%c0_1, %c0_2] : memref<8x1xf32, #tpu.memory_space<vmem>>, vector<8x1xf32>
    %2 = vector.broadcast %1 : vector<8x1xf32> to vector<8x256xf32>
    %3 = arith.mulf %0, %2 : vector<8x256xf32>
    %c0_3 = arith.constant 0 : index
    %c0_4 = arith.constant 0 : index
    %4 = vector.load %arg3[%c0_3, %c0_4] : memref<8x1xf32, #tpu.memory_space<vmem>>, vector<8x1xf32>
    %5 = vector.broadcast %4 : vector<8x1xf32> to vector<8x256xf32>
    %6 = arith.addf %3, %5 : vector<8x256xf32>
    %c0_5 = arith.constant 0 : index
    %c0_6 = arith.constant 0 : index
    %7 = vector.load %arg5[%c0_5, %c0_6] : memref<8x256xf32, #tpu.memory_space<vmem>>, vector<8x256xf32>
    tpu.vector_store %arg5[%c0_5, %c0_6], %6 {strides = array<i32>} : memref<8x256xf32, #tpu.memory_space<vmem>>, vector<8x256xf32>,
    return
  }
  func.func @transform_0(%arg0: i32, %arg1: i32) -> (i32, i32) {
    %c0_i32 = arith.constant 0 : i32
    %c0_i32_0 = arith.constant 0 : i32
    return %arg0, %c0_i32 : i32, i32
  }
  func.func @transform_1(%arg0: i32, %arg1: i32) -> (i32, i32) {
    %c0_i32 = arith.constant 0 : i32
    %c0_i32_0 = arith.constant 0 : i32
    return %arg0, %c0_i32 : i32, i32
  }
  func.func @transform_2(%arg0: i32, %arg1: i32) -> (i32, i32) {
    %c0_i32 = arith.constant 0 : i32
    return %arg0, %arg1 : i32, i32
  }
  func.func @transform_3(%arg0: i32, %arg1: i32) -> (i32, i32) {
    %c0_i32 = arith.constant 0 : i32
    return %arg0, %arg1 : i32, i32
  }
}

</mosaic_0001>

<bundles_post_ra>
// kernel: tpu_custom_call.1
= control target key start
LH: loop header
LB: loop body
LE: loop exit
PB: predicated region body
PF: predicated region fallthrough
CT: control target
= control target key end

     0   :  { %s117_s0 = inlined_call_operand.vmem [shape: f32[8,1], index: 0, kind: input, shape index: {}]   ;;  %s118_s1 = inlined_call_operand.vmem [shape: f32[8,1], index: 1, kind: input, shape index: {}]   ;;  %s119_s2 = inlined_call_operand.vmem [shape: f32[8,256], index: 2, kind: input, shape index: {}]   ;;  %s120_s3 = inlined_call_operand.hbm [shape: f32[8,256], index: 3, kind: output, shape index: {}]  }
   0x1   :  { %v17_v0 = vld [vmem:[%s117_s0] sm:$0xff] }
   0x2   :  { %8 = vsyncpa [#allocation3], 0  ;;  %v80_v1 = vmov 0   ;;  %v25_v2 = vld [vmem:[%s118_s1] sm:$0xff]  ;;  %v16_v5 = vld [vmem:[%s119_s2 + $0x8] sm:$0xff]  ;;  %s81_s0 = smov [#allocation2]  }
   0x3   :  { %53 = vset.pattern.permute.xlu0 %v80_v1  ;;  %v15_v4 = vld [vmem:[%s119_s2] sm:$0xff]  ;;  %s40_s20 = sshll.u32 %s81_s0, 4  ;;  %s42_s23 = sshll.u32 %s120_s3, 4  ;;  %s41_s20 = int_to_ptr.vmem [resolvable:$true] %s40_s20  ;;  %s43_s23 = int_to_ptr.hbm [resolvable:$true] %s42_s23 }
   0x4   :  { %20 = vperm.xlu0 %53, %v17_v0  }
   0xc   :  { %28 = vperm.xlu0 %53, %v25_v2  }
  0x76   :  { %v21_v3 = vpop.permute.xlu0 %20 }
  0x77   :  { %v23_v6 = vmul.f32 %v21_v3, %v15_v4  ;;  %v24_v7 = vmul.f32 %v21_v3, %v16_v5 }
  0x7e   :  { %v29_v8 = vpop.permute.xlu0 %28 }
  0x7f   :  { %v31_v9 = vadd.f32 %v29_v8, %v23_v6  ;;  %v32_v10 = vadd.f32 %v29_v8, %v24_v7 }
  0x81   :  { %33 = vst [vmem:[#allocation2] sm:$0xff] %v31_v9 }
  0x82   :  { %34 = vst [vmem:[#allocation2 + $0x8] sm:$0xff] %v32_v10 }
  0x83   :  { %45 = dma.vmem_to_hbm [thread:$0]  %s41_s20, 256, %s43_s23, [#allocation3]  }
  0x84   :  { %78 = dma.done.wait [#allocation3], 256  }
  0x85   :  { %79 = vsyncadd [#allocation3], 4294967040 }
  0x86   :  { %50 = vsyncpa [#allocation3], 1 }

</bundles_post_ra>
